<compile_context>
chip_gen: v6e
topology: v6e:2x2x1
jax: 0.10.0
libtpu: 0.0.40
codegen_flags: <defaults>
</compile_context>

<pallas_src>
import functools

import jax
import jax.numpy as jnp
from jax.experimental import pallas as pl
from jax.experimental.pallas import tpu as pltpu


def _round_up(n, m):
    return ((n + m - 1) // m) * m


def mlp_kernel(x_ref, w1_ref, b1_ref, w2_ref, b2_ref, w3_ref, b3_ref, o_ref, *,
               chunk):
    """x_ref: (4, TB); o_ref: (3, TB); weights (out, in); biases (out, 1). All f32."""
    tb = o_ref.shape[-1]
    n_chunks = tb // chunk

    # Tiny weights/biases: loaded once per grid step, live in a handful of vregs
    # across the whole chunk loop.
    w1, b1 = w1_ref[...], b1_ref[...]
    w2, b2 = w2_ref[...], b2_ref[...]
    w3, b3 = w3_ref[...], b3_ref[...]

    def dense(w, b, h, relu):
        # h: (n_in, chunk) f32 held in vregs.  K is tiny (4/10/10), so the
        # contraction is a fully-unrolled VPU rank-1 broadcast-FMA; no MXU, and
        # the accumulator never round-trips through VMEM.
        n_out, n_in = w.shape
        c = h.shape[-1]
        acc = jnp.broadcast_to(b, (n_out, c))            # lane-broadcast bias
        for k in range(n_in):                            # fully unrolled
            acc = acc + w[:, k:k + 1] * h[k:k + 1, :]    # (n_out,1) * (1,c)
        return jnp.maximum(acc, 0.0) if relu else acc

    # Register-blocked walk over the batch tile: each `chunk` of lanes keeps all
    # activations in vregs; only the final (3, chunk) logits are stored (lane-dense).
    @pl.loop(0, n_chunks)
    def _(c):
        col = pl.multiple_of(c * chunk, 128)
        xc = x_ref[:, pl.ds(col, chunk)]                 # (4, chunk)
        h = dense(w1, b1, xc, relu=True)                 # (10, chunk)
        h = dense(w2, b2, h, relu=True)                  # (10, chunk)
        logits = dense(w3, b3, h, relu=False)            # (3, chunk)
        o_ref[:, pl.ds(col, chunk)] = logits.astype(o_ref.dtype)


def _tile_sizes(batch, block_batch):
    """Pick (tb, chunk): tb = batch tile (multiple of 128 lanes and of chunk);
    chunk = register-blocked lane width processed fully in vregs."""
    b128 = _round_up(batch, 128)
    # Cap so the 1-D parallel grid has >=2 steps whenever the batch allows it
    # (keeps both v7x TensorCores busy); VMEM is never the constraint here.
    half = max(128, _round_up((batch + 1) // 2, 128))
    tb = max(128, min(_round_up(block_batch, 128), b128, half))
    if tb >= 512:
        tb = (tb // 512) * 512      # make tb divisible by the 512-lane chunk
        chunk = 512
    else:
        chunk = tb                  # 128 / 256 / 384: single in-register chunk
    return tb, chunk


@functools.partial(jax.jit, static_argnames=("block_batch",))
def energy_classifier_forward_fm(xT, params, *, block_batch=16384):
    """Feature-major fast path: xT (4, B) -> logits (3, B).  No pad, no transposes;
    the batch lives on the 128-lane axis so all loads/stores are lane-dense."""
    B = xT.shape[-1]
    w1, b1 = params["w1"], params["b1"]
    w2, b2 = params["w2"], params["b2"]
    w3, b3 = params["w3"], params["b3"]

    tb, chunk = _tile_sizes(B, block_batch)
    grid = (pl.cdiv(B, tb),)

    moving = lambda i: (0, i)     # x / out tiles advance along the lane (batch) axis
    pinned = lambda i: (0, 0)     # weights & biases: DMA'd once, stay VMEM-resident

    return pl.pallas_call(
        functools.partial(mlp_kernel, chunk=chunk),
        out_shape=jax.ShapeDtypeStruct((3, B), jnp.float32),
        grid=grid,
        in_specs=[
            pl.BlockSpec((4, tb), moving),
            pl.BlockSpec(w1.shape, pinned),
            pl.BlockSpec(b1.shape, pinned),
            pl.BlockSpec(w2.shape, pinned),
            pl.BlockSpec(b2.shape, pinned),
            pl.BlockSpec(w3.shape, pinned),
            pl.BlockSpec(b3.shape, pinned),
        ],
        out_specs=pl.BlockSpec((3, tb), moving),
        compiler_params=pltpu.CompilerParams(
            dimension_semantics=("parallel",)),   # megacore sharding on v7x
    )(xT.astype(jnp.float32), w1, b1, w2, b2, w3, b3)


@functools.partial(jax.jit, static_argnames=("block_batch",))
def energy_classifier_forward(x, params, *, block_batch=16384):
    """PyTorch-compatible signature: x (B, 4) float32 -> logits (B, 3) float32.
    The two boundary transposes are extra XLA HBM passes; perf-sensitive callers
    that can keep data feature-major should use energy_classifier_forward_fm."""
    logitsT = energy_classifier_forward_fm(
        x.astype(jnp.float32).T, params, block_batch=block_batch)
    return logitsT.T


def init_params(key):
    """PyTorch nn.Linear default init (uniform +-1/sqrt(fan_in)), PyTorch weight layout."""
    def linear(k, fan_in, fan_out):
        kw, kb = jax.random.split(k)
        bound = 1.0 / jnp.sqrt(fan_in)
        w = jax.random.uniform(kw, (fan_out, fan_in), jnp.float32, -bound, bound)
        b = jax.random.uniform(kb, (fan_out, 1), jnp.float32, -bound, bound)
        return w, b

    k1, k2, k3 = jax.random.split(key, 3)
    w1, b1 = linear(k1, 4, 10)
    w2, b2 = linear(k2, 10, 10)
    w3, b3 = linear(k3, 10, 3)
    return {"w1": w1, "b1": b1, "w2": w2, "b2": b2, "w3": w3, "b3": b3}


def reference_forward(x, p):
    h1 = jnp.maximum(x @ p["w1"].T + p["b1"][:, 0], 0.0)
    h2 = jnp.maximum(h1 @ p["w2"].T + p["b2"][:, 0], 0.0)
    return h2 @ p["w3"].T + p["b3"][:, 0]


# TODO(synk): compute_energies / compute_energy helpers are not part of forward() and
# are left unimplemented.

if __name__ == "__main__":
    key = jax.random.PRNGKey(0)
    kp, kx = jax.random.split(key)
    params = init_params(kp)

    batch = 300   # not a multiple of 128 -> exercises the masked edge block (grid of 2)
    x = jax.random.normal(kx, (batch, 4), jnp.float32)

    # PyTorch-compatible path (B,4) -> (B,3)
    logits = jax.block_until_ready(energy_classifier_forward(x, params))
    ref = reference_forward(x, params)
    assert logits.shape == (batch, 3)
    assert jnp.allclose(logits, ref, atol=1e-5, rtol=1e-5), "mismatch vs reference"

    # feature-major fast path (no boundary transposes)
    logits_fm = jax.block_until_ready(energy_classifier_forward_fm(x.T, params))
    assert logits_fm.shape == (3, batch)
    assert jnp.allclose(logits_fm.T, ref, atol=1e-5, rtol=1e-5), "fm path mismatch"

    print("KERNEL_OK")
</pallas_src>

<mosaic_0001>
module attributes {stable_mosaic.version = 11 : i64} {
  func.func @mlp_kernel(%arg0: i32, %arg1: memref<4x256xf32, #tpu.memory_space<vmem>>, %arg2: memref<10x4xf32, #tpu.memory_space<vmem>>, %arg3: memref<10x1xf32, #tpu.memory_space<vmem>>, %arg4: memref<10x10xf32, #tpu.memory_space<vmem>>, %arg5: memref<10x1xf32, #tpu.memory_space<vmem>>, %arg6: memref<3x10xf32, #tpu.memory_space<vmem>>, %arg7: memref<3x1xf32, #tpu.memory_space<vmem>>, %arg8: memref<3x256xf32, #tpu.memory_space<vmem>>) attributes {dimension_semantics = [#tpu.dimension_semantics<parallel>], iteration_bounds = array<i64: 2>, scalar_prefetch = 0 : i64, scratch_operands = 0 : i64, tpu.core_type = #tpu.core_type<tc>, window_params = [{transform_indices = @transform_0, window_bounds = array<i64: 4, 256>}, {pipeline_mode = #tpu.pipeline_mode<synchronous>, transform_indices = @transform_1, window_bounds = array<i64: 10, 4>}, {pipeline_mode = #tpu.pipeline_mode<synchronous>, transform_indices = @transform_2, window_bounds = array<i64: 10, 1>}, {pipeline_mode = #tpu.pipeline_mode<synchronous>, transform_indices = @transform_3, window_bounds = array<i64: 10, 10>}, {pipeline_mode = #tpu.pipeline_mode<synchronous>, transform_indices = @transform_4, window_bounds = array<i64: 10, 1>}, {pipeline_mode = #tpu.pipeline_mode<synchronous>, transform_indices = @transform_5, window_bounds = array<i64: 3, 10>}, {pipeline_mode = #tpu.pipeline_mode<synchronous>, transform_indices = @transform_6, window_bounds = array<i64: 3, 1>}, {transform_indices = @transform_7, window_bounds = array<i64: 3, 256>}]} {
    %c0 = arith.constant 0 : index
    %c0_0 = arith.constant 0 : index
    %0 = vector.load %arg2[%c0, %c0_0] : memref<10x4xf32, #tpu.memory_space<vmem>>, vector<10x4xf32>
    %c0_1 = arith.constant 0 : index
    %c0_2 = arith.constant 0 : index
    %1 = vector.load %arg3[%c0_1, %c0_2] : memref<10x1xf32, #tpu.memory_space<vmem>>, vector<10x1xf32>
    %c0_3 = arith.constant 0 : index
    %c0_4 = arith.constant 0 : index
    %2 = vector.load %arg4[%c0_3, %c0_4] : memref<10x10xf32, #tpu.memory_space<vmem>>, vector<10x10xf32>
    %c0_5 = arith.constant 0 : index
    %c0_6 = arith.constant 0 : index
    %3 = vector.load %arg5[%c0_5, %c0_6] : memref<10x1xf32, #tpu.memory_space<vmem>>, vector<10x1xf32>
    %c0_7 = arith.constant 0 : index
    %c0_8 = arith.constant 0 : index
    %4 = vector.load %arg6[%c0_7, %c0_8] : memref<3x10xf32, #tpu.memory_space<vmem>>, vector<3x10xf32>
    %c0_9 = arith.constant 0 : index
    %c0_10 = arith.constant 0 : index
    %5 = vector.load %arg7[%c0_9, %c0_10] : memref<3x1xf32, #tpu.memory_space<vmem>>, vector<3x1xf32>
    %c0_i32 = arith.constant 0 : i32
    %c1_i32 = arith.constant 1 : i32
    %6 = arith.muli %c0_i32, %c1_i32 : i32
    %c0_i32_11 = arith.constant 0 : i32
    %7 = arith.addi %c0_i32_11, %6 : i32
    %c256_i32 = arith.constant 256 : i32
    %8 = arith.muli %7, %c256_i32 : i32
    %9 = tpu.assume_multiple %8, 128 : i32
    %c0_12 = arith.constant 0 : index
    %10 = arith.index_cast %9 : i32 to index
    %11 = vector.load %arg1[%c0_12, %10] : memref<4x256xf32, #tpu.memory_space<vmem>>, vector<4x256xf32>
    %12 = vector.shape_cast %1 : vector<10x1xf32> to vector<10x1xf32>
    %13 = vector.broadcast %12 : vector<10x1xf32> to vector<10x256xf32>
    %14 = vector.extract_strided_slice %0 {offsets = [0, 0], sizes = [10, 1], strides = [1, 1]} : vector<10x4xf32> to vector<10x1xf32>
    %15 = vector.extract_strided_slice %11 {offsets = [0, 0], sizes = [1, 256], strides = [1, 1]} : vector<4x256xf32> to vector<1x256xf32>
    %16 = vector.broadcast %14 : vector<10x1xf32> to vector<10x256xf32>
    %17 = vector.broadcast %15 : vector<1x256xf32> to vector<10x256xf32>
    %18 = arith.mulf %16, %17 : vector<10x256xf32>
    %19 = arith.addf %13, %18 : vector<10x256xf32>
    %20 = vector.extract_strided_slice %0 {offsets = [0, 1], sizes = [10, 1], strides = [1, 1]} : vector<10x4xf32> to vector<10x1xf32>
    %21 = vector.extract_strided_slice %11 {offsets = [1, 0], sizes = [1, 256], strides = [1, 1]} : vector<4x256xf32> to vector<1x256xf32>
    %22 = vector.broadcast %20 : vector<10x1xf32> to vector<10x256xf32>
    %23 = vector.broadcast %21 : vector<1x256xf32> to vector<10x256xf32>
    %24 = arith.mulf %22, %23 : vector<10x256xf32>
    %25 = arith.addf %19, %24 : vector<10x256xf32>
    %26 = vector.extract_strided_slice %0 {offsets = [0, 2], sizes = [10, 1], strides = [1, 1]} : vector<10x4xf32> to vector<10x1xf32>
    %27 = vector.extract_strided_slice %11 {offsets = [2, 0], sizes = [1, 256], strides = [1, 1]} : vector<4x256xf32> to vector<1x256xf32>
    %28 = vector.broadcast %26 : vector<10x1xf32> to vector<10x256xf32>
    %29 = vector.broadcast %27 : vector<1x256xf32> to vector<10x256xf32>
    %30 = arith.mulf %28, %29 : vector<10x256xf32>
    %31 = arith.addf %25, %30 : vector<10x256xf32>
    %32 = vector.extract_strided_slice %0 {offsets = [0, 3], sizes = [10, 1], strides = [1, 1]} : vector<10x4xf32> to vector<10x1xf32>
    %33 = vector.extract_strided_slice %11 {offsets = [3, 0], sizes = [1, 256], strides = [1, 1]} : vector<4x256xf32> to vector<1x256xf32>
    %34 = vector.broadcast %32 : vector<10x1xf32> to vector<10x256xf32>
    %35 = vector.broadcast %33 : vector<1x256xf32> to vector<10x256xf32>
    %36 = arith.mulf %34, %35 : vector<10x256xf32>
    %37 = arith.addf %31, %36 : vector<10x256xf32>
    %cst = arith.constant 0.000000e+00 : f32
    %38 = vector.broadcast %cst : f32 to vector<10x256xf32>
    %39 = arith.maximumf %37, %38 : vector<10x256xf32>
    %40 = vector.shape_cast %3 : vector<10x1xf32> to vector<10x1xf32>
    %41 = vector.broadcast %40 : vector<10x1xf32> to vector<10x256xf32>
    %42 = vector.extract_strided_slice %2 {offsets = [0, 0], sizes = [10, 1], strides = [1, 1]} : vector<10x10xf32> to vector<10x1xf32>
    %43 = vector.extract_strided_slice %39 {offsets = [0, 0], sizes = [1, 256], strides = [1, 1]} : vector<10x256xf32> to vector<1x256xf32>
    %44 = vector.broadcast %42 : vector<10x1xf32> to vector<10x256xf32>
    %45 = vector.broadcast %43 : vector<1x256xf32> to vector<10x256xf32>
    %46 = arith.mulf %44, %45 : vector<10x256xf32>
    %47 = arith.addf %41, %46 : vector<10x256xf32>
    %48 = vector.extract_strided_slice %2 {offsets = [0, 1], sizes = [10, 1], strides = [1, 1]} : vector<10x10xf32> to vector<10x1xf32>
    %49 = vector.extract_strided_slice %39 {offsets = [1, 0], sizes = [1, 256], strides = [1, 1]} : vector<10x256xf32> to vector<1x256xf32>
    %50 = vector.broadcast %48 : vector<10x1xf32> to vector<10x256xf32>
    %51 = vector.broadcast %49 : vector<1x256xf32> to vector<10x256xf32>
    %52 = arith.mulf %50, %51 : vector<10x256xf32>
    %53 = arith.addf %47, %52 : vector<10x256xf32>
    %54 = vector.extract_strided_slice %2 {offsets = [0, 2], sizes = [10, 1], strides = [1, 1]} : vector<10x10xf32> to vector<10x1xf32>
    %55 = vector.extract_strided_slice %39 {offsets = [2, 0], sizes = [1, 256], strides = [1, 1]} : vector<10x256xf32> to vector<1x256xf32>
    %56 = vector.broadcast %54 : vector<10x1xf32> to vector<10x256xf32>
    %57 = vector.broadcast %55 : vector<1x256xf32> to vector<10x256xf32>
    %58 = arith.mulf %56, %57 : vector<10x256xf32>
    %59 = arith.addf %53, %58 : vector<10x256xf32>
    %60 = vector.extract_strided_slice %2 {offsets = [0, 3], sizes = [10, 1], strides = [1, 1]} : vector<10x10xf32> to vector<10x1xf32>
    %61 = vector.extract_strided_slice %39 {offsets = [3, 0], sizes = [1, 256], strides = [1, 1]} : vector<10x256xf32> to vector<1x256xf32>
    %62 = vector.broadcast %60 : vector<10x1xf32> to vector<10x256xf32>
    %63 = vector.broadcast %61 : vector<1x256xf32> to vector<10x256xf32>
    %64 = arith.mulf %62, %63 : vector<10x256xf32>
    %65 = arith.addf %59, %64 : vector<10x256xf32>
    %66 = vector.extract_strided_slice %2 {offsets = [0, 4], sizes = [10, 1], strides = [1, 1]} : vector<10x10xf32> to vector<10x1xf32>
    %67 = vector.extract_strided_slice %39 {offsets = [4, 0], sizes = [1, 256], strides = [1, 1]} : vector<10x256xf32> to vector<1x256xf32>
    %68 = vector.broadcast %66 : vector<10x1xf32> to vector<10x256xf32>
    %69 = vector.broadcast %67 : vector<1x256xf32> to vector<10x256xf32>
    %70 = arith.mulf %68, %69 : vector<10x256xf32>
    %71 = arith.addf %65, %70 : vector<10x256xf32>
    %72 = vector.extract_strided_slice %2 {offsets = [0, 5], sizes = [10, 1], strides = [1, 1]} : vector<10x10xf32> to vector<10x1xf32>
    %73 = vector.extract_strided_slice %39 {offsets = [5, 0], sizes = [1, 256], strides = [1, 1]} : vector<10x256xf32> to vector<1x256xf32>
    %74 = vector.broadcast %72 : vector<10x1xf32> to vector<10x256xf32>
    %75 = vector.broadcast %73 : vector<1x256xf32> to vector<10x256xf32>
    %76 = arith.mulf %74, %75 : vector<10x256xf32>
    %77 = arith.addf %71, %76 : vector<10x256xf32>
    %78 = vector.extract_strided_slice %2 {offsets = [0, 6], sizes = [10, 1], strides = [1, 1]} : vector<10x10xf32> to vector<10x1xf32>
    %79 = vector.extract_strided_slice %39 {offsets = [6, 0], sizes = [1, 256], strides = [1, 1]} : vector<10x256xf32> to vector<1x256xf32>
    %80 = vector.broadcast %78 : vector<10x1xf32> to vector<10x256xf32>
    %81 = vector.broadcast %79 : vector<1x256xf32> to vector<10x256xf32>
    %82 = arith.mulf %80, %81 : vector<10x256xf32>
    %83 = arith.addf %77, %82 : vector<10x256xf32>
    %84 = vector.extract_strided_slice %2 {offsets = [0, 7], sizes = [10, 1], strides = [1, 1]} : vector<10x10xf32> to vector<10x1xf32>
    %85 = vector.extract_strided_slice %39 {offsets = [7, 0], sizes = [1, 256], strides = [1, 1]} : vector<10x256xf32> to vector<1x256xf32>
    %86 = vector.broadcast %84 : vector<10x1xf32> to vector<10x256xf32>
    %87 = vector.broadcast %85 : vector<1x256xf32> to vector<10x256xf32>
    %88 = arith.mulf %86, %87 : vector<10x256xf32>
    %89 = arith.addf %83, %88 : vector<10x256xf32>
    %90 = vector.extract_strided_slice %2 {offsets = [0, 8], sizes = [10, 1], strides = [1, 1]} : vector<10x10xf32> to vector<10x1xf32>
    %91 = vector.extract_strided_slice %39 {offsets = [8, 0], sizes = [1, 256], strides = [1, 1]} : vector<10x256xf32> to vector<1x256xf32>
    %92 = vector.broadcast %90 : vector<10x1xf32> to vector<10x256xf32>
    %93 = vector.broadcast %91 : vector<1x256xf32> to vector<10x256xf32>
    %94 = arith.mulf %92, %93 : vector<10x256xf32>
    %95 = arith.addf %89, %94 : vector<10x256xf32>
    %96 = vector.extract_strided_slice %2 {offsets = [0, 9], sizes = [10, 1], strides = [1, 1]} : vector<10x10xf32> to vector<10x1xf32>
    %97 = vector.extract_strided_slice %39 {offsets = [9, 0], sizes = [1, 256], strides = [1, 1]} : vector<10x256xf32> to vector<1x256xf32>
    %98 = vector.broadcast %96 : vector<10x1xf32> to vector<10x256xf32>
    %99 = vector.broadcast %97 : vector<1x256xf32> to vector<10x256xf32>
    %100 = arith.mulf %98, %99 : vector<10x256xf32>
    %101 = arith.addf %95, %100 : vector<10x256xf32>
    %cst_13 = arith.constant 0.000000e+00 : f32
    %102 = vector.broadcast %cst_13 : f32 to vector<10x256xf32>
    %103 = arith.maximumf %101, %102 : vector<10x256xf32>
    %104 = vector.shape_cast %5 : vector<3x1xf32> to vector<3x1xf32>
    %105 = vector.broadcast %104 : vector<3x1xf32> to vector<3x256xf32>
    %106 = vector.extract_strided_slice %4 {offsets = [0, 0], sizes = [3, 1], strides = [1, 1]} : vector<3x10xf32> to vector<3x1xf32>
    %107 = vector.extract_strided_slice %103 {offsets = [0, 0], sizes = [1, 256], strides = [1, 1]} : vector<10x256xf32> to vector<1x256xf32>
    %108 = vector.broadcast %106 : vector<3x1xf32> to vector<3x256xf32>
    %109 = vector.broadcast %107 : vector<1x256xf32> to vector<3x256xf32>
    %110 = arith.mulf %108, %109 : vector<3x256xf32>
    %111 = arith.addf %105, %110 : vector<3x256xf32>
    %112 = vector.extract_strided_slice %4 {offsets = [0, 1], sizes = [3, 1], strides = [1, 1]} : vector<3x10xf32> to vector<3x1xf32>
    %113 = vector.extract_strided_slice %103 {offsets = [1, 0], sizes = [1, 256], strides = [1, 1]} : vector<10x256xf32> to vector<1x256xf32>
    %114 = vector.broadcast %112 : vector<3x1xf32> to vector<3x256xf32>
    %115 = vector.broadcast %113 : vector<1x256xf32> to vector<3x256xf32>
    %116 = arith.mulf %114, %115 : vector<3x256xf32>
    %117 = arith.addf %111, %116 : vector<3x256xf32>
    %118 = vector.extract_strided_slice %4 {offsets = [0, 2], sizes = [3, 1], strides = [1, 1]} : vector<3x10xf32> to vector<3x1xf32>
    %119 = vector.extract_strided_slice %103 {offsets = [2, 0], sizes = [1, 256], strides = [1, 1]} : vector<10x256xf32> to vector<1x256xf32>
    %120 = vector.broadcast %118 : vector<3x1xf32> to vector<3x256xf32>
    %121 = vector.broadcast %119 : vector<1x256xf32> to vector<3x256xf32>
    %122 = arith.mulf %120, %121 : vector<3x256xf32>
    %123 = arith.addf %117, %122 : vector<3x256xf32>
    %124 = vector.extract_strided_slice %4 {offsets = [0, 3], sizes = [3, 1], strides = [1, 1]} : vector<3x10xf32> to vector<3x1xf32>
    %125 = vector.extract_strided_slice %103 {offsets = [3, 0], sizes = [1, 256], strides = [1, 1]} : vector<10x256xf32> to vector<1x256xf32>
    %126 = vector.broadcast %124 : vector<3x1xf32> to vector<3x256xf32>
    %127 = vector.broadcast %125 : vector<1x256xf32> to vector<3x256xf32>
    %128 = arith.mulf %126, %127 : vector<3x256xf32>
    %129 = arith.addf %123, %128 : vector<3x256xf32>
    %130 = vector.extract_strided_slice %4 {offsets = [0, 4], sizes = [3, 1], strides = [1, 1]} : vector<3x10xf32> to vector<3x1xf32>
    %131 = vector.extract_strided_slice %103 {offsets = [4, 0], sizes = [1, 256], strides = [1, 1]} : vector<10x256xf32> to vector<1x256xf32>
    %132 = vector.broadcast %130 : vector<3x1xf32> to vector<3x256xf32>
    %133 = vector.broadcast %131 : vector<1x256xf32> to vector<3x256xf32>
    %134 = arith.mulf %132, %133 : vector<3x256xf32>
    %135 = arith.addf %129, %134 : vector<3x256xf32>
    %136 = vector.extract_strided_slice %4 {offsets = [0, 5], sizes = [3, 1], strides = [1, 1]} : vector<3x10xf32> to vector<3x1xf32>
    %137 = vector.extract_strided_slice %103 {offsets = [5, 0], sizes = [1, 256], strides = [1, 1]} : vector<10x256xf32> to vector<1x256xf32>
    %138 = vector.broadcast %136 : vector<3x1xf32> to vector<3x256xf32>
    %139 = vector.broadcast %137 : vector<1x256xf32> to vector<3x256xf32>
    %140 = arith.mulf %138, %139 : vector<3x256xf32>
    %141 = arith.addf %135, %140 : vector<3x256xf32>
    %142 = vector.extract_strided_slice %4 {offsets = [0, 6], sizes = [3, 1], strides = [1, 1]} : vector<3x10xf32> to vector<3x1xf32>
    %143 = vector.extract_strided_slice %103 {offsets = [6, 0], sizes = [1, 256], strides = [1, 1]} : vector<10x256xf32> to vector<1x256xf32>
    %144 = vector.broadcast %142 : vector<3x1xf32> to vector<3x256xf32>
    %145 = vector.broadcast %143 : vector<1x256xf32> to vector<3x256xf32>
    %146 = arith.mulf %144, %145 : vector<3x256xf32>
    %147 = arith.addf %141, %146 : vector<3x256xf32>
    %148 = vector.extract_strided_slice %4 {offsets = [0, 7], sizes = [3, 1], strides = [1, 1]} : vector<3x10xf32> to vector<3x1xf32>
    %149 = vector.extract_strided_slice %103 {offsets = [7, 0], sizes = [1, 256], strides = [1, 1]} : vector<10x256xf32> to vector<1x256xf32>
    %150 = vector.broadcast %148 : vector<3x1xf32> to vector<3x256xf32>
    %151 = vector.broadcast %149 : vector<1x256xf32> to vector<3x256xf32>
    %152 = arith.mulf %150, %151 : vector<3x256xf32>
    %153 = arith.addf %147, %152 : vector<3x256xf32>
    %154 = vector.extract_strided_slice %4 {offsets = [0, 8], sizes = [3, 1], strides = [1, 1]} : vector<3x10xf32> to vector<3x1xf32>
    %155 = vector.extract_strided_slice %103 {offsets = [8, 0], sizes = [1, 256], strides = [1, 1]} : vector<10x256xf32> to vector<1x256xf32>
    %156 = vector.broadcast %154 : vector<3x1xf32> to vector<3x256xf32>
    %157 = vector.broadcast %155 : vector<1x256xf32> to vector<3x256xf32>
    %158 = arith.mulf %156, %157 : vector<3x256xf32>
    %159 = arith.addf %153, %158 : vector<3x256xf32>
    %160 = vector.extract_strided_slice %4 {offsets = [0, 9], sizes = [3, 1], strides = [1, 1]} : vector<3x10xf32> to vector<3x1xf32>
    %161 = vector.extract_strided_slice %103 {offsets = [9, 0], sizes = [1, 256], strides = [1, 1]} : vector<10x256xf32> to vector<1x256xf32>
    %162 = vector.broadcast %160 : vector<3x1xf32> to vector<3x256xf32>
    %163 = vector.broadcast %161 : vector<1x256xf32> to vector<3x256xf32>
    %164 = arith.mulf %162, %163 : vector<3x256xf32>
    %165 = arith.addf %159, %164 : vector<3x256xf32>
    %c0_14 = arith.constant 0 : index
    %166 = arith.index_cast %9 : i32 to index
    %167 = vector.load %arg8[%c0_14, %166] : memref<3x256xf32, #tpu.memory_space<vmem>>, vector<3x256xf32>
    tpu.vector_store %arg8[%c0_14, %166], %165 {strides = array<i32>} : memref<3x256xf32, #tpu.memory_space<vmem>>, vector<3x256xf32>,
    %c1_i32_15 = arith.constant 1 : i32
    return
  }
  func.func @transform_0(%arg0: i32) -> (i32, i32) {
    %c0_i32 = arith.constant 0 : i32
    %c0_i32_0 = arith.constant 0 : i32
    return %c0_i32, %arg0 : i32, i32
  }
  func.func @transform_1(%arg0: i32) -> (i32, i32) {
    %c0_i32 = arith.constant 0 : i32
    %c0_i32_0 = arith.constant 0 : i32
    %c0_i32_1 = arith.constant 0 : i32
    return %c0_i32, %c0_i32_0 : i32, i32
  }
  func.func @transform_2(%arg0: i32) -> (i32, i32) {
    %c0_i32 = arith.constant 0 : i32
    %c0_i32_0 = arith.constant 0 : i32
    %c0_i32_1 = arith.constant 0 : i32
    return %c0_i32, %c0_i32_0 : i32, i32
  }
  func.func @transform_3(%arg0: i32) -> (i32, i32) {
    %c0_i32 = arith.constant 0 : i32
    %c0_i32_0 = arith.constant 0 : i32
    %c0_i32_1 = arith.constant 0 : i32
    return %c0_i32, %c0_i32_0 : i32, i32
  }
  func.func @transform_4(%arg0: i32) -> (i32, i32) {
    %c0_i32 = arith.constant 0 : i32
    %c0_i32_0 = arith.constant 0 : i32
    %c0_i32_1 = arith.constant 0 : i32
    return %c0_i32, %c0_i32_0 : i32, i32
  }
  func.func @transform_5(%arg0: i32) -> (i32, i32) {
    %c0_i32 = arith.constant 0 : i32
    %c0_i32_0 = arith.constant 0 : i32
    %c0_i32_1 = arith.constant 0 : i32
    return %c0_i32, %c0_i32_0 : i32, i32
  }
  func.func @transform_6(%arg0: i32) -> (i32, i32) {
    %c0_i32 = arith.constant 0 : i32
    %c0_i32_0 = arith.constant 0 : i32
    %c0_i32_1 = arith.constant 0 : i32
    return %c0_i32, %c0_i32_0 : i32, i32
  }
  func.func @transform_7(%arg0: i32) -> (i32, i32) {
    %c0_i32 = arith.constant 0 : i32
    %c0_i32_0 = arith.constant 0 : i32
    return %c0_i32, %arg0 : i32, i32
  }
}

</mosaic_0001>

<bundles_post_ra>
// kernel: energy_classifier_forward_fm.1
= control target key start
LH: loop header
LB: loop body
LE: loop exit
PB: predicated region body
PF: predicated region fallthrough
CT: control target
= control target key end

     0   :  { %12 = vsyncpa [#allocation3], 0  ;;  %s1589_s0 = inlined_call_operand.vmem [shape: f32[4,300], index: 0, kind: input, shape index: {}]   ;;  %s1590_s1 = inlined_call_operand.vmem [shape: f32[10,4], index: 1, kind: input, shape index: {}]   ;;  %s1591_s2 = inlined_call_operand.vmem [shape: f32[10,1], index: 2, kind: input, shape index: {}]   ;;  %s1592_s3 = inlined_call_operand.vmem [shape: f32[10,10], index: 3, kind: input, shape index: {}]   ;;  %s1593_s4 = inlined_call_operand.vmem [shape: f32[10,1], index: 4, kind: input, shape index: {}]   ;;  %s1594_s5 = inlined_call_operand.vmem [shape: f32[3,10], index: 5, kind: input, shape index: {}]   ;;  %s1595_s6 = inlined_call_operand.vmem [shape: f32[3,1], index: 6, kind: input, shape index: {}]   ;;  %s1596_s7 = inlined_call_operand.hbm [shape: f32[3,300], index: 7, kind: output, shape index: {}]  }
   0x1   :  { %14 = vsyncpa [#allocation3 + $0x1], 0  ;;  %s1188_s24 = smov 0   ;;  %s1190_s25 = smov 0  }
   0x2   :  { %s1192_s26 = smov 0   ;;  %s1194_s27 = smov 0  }
   0x3 LB: > { %s1209_s28 = sadd.s32 4294967295, %s1135_s27   ;;  %s975_s29 = sadd.s32 4294967294, %s1135_s27   ;;  %s1135_s27 = sphi %s1194_s27, %s1602_s27   ;;  %s1131_s26 = sphi %s1192_s26, %s1601_s26   ;;  %s1127_s25 = sphi %s1190_s25, %s1600_s25   ;;  %s1123_s24 = sphi %s1188_s24, %s1599_s24  }
   0x4   : > { %s1213_s30 = sadd.s32 1, %s1135_s27   ;;  %s179_s8 = sadd.s32 1, %s1131_s26 }
   0x5   : > { %s176_s9 = ssub.s32 %s1135_s27, %s1213_s30  ;;  %p189_p0 = scmp.ne.s32.totalorder %s1131_s26, %s1127_s25 }
   0x6   : > { %p177_p1 = scmp.eq.s32.totalorder %s176_s9, 0  ;;  %p190_p2 = scmp.eq.s32.totalorder %s1209_s28, 1 }
   0x7   : > { %p195_p3 = scmp.ne.s32.totalorder %s1127_s25, %s1123_s24  ;;  %p196_p4 = scmp.eq.s32.totalorder %s975_s29, 1 }
   0x8   : > { %s1224_s10 = scalar_select %p177_p1, %s1131_s26, %s179_s8  }
   0x9   : > { %p1226_p5 = por %p190_p2, %p189_p0  ;;  %p1230_p6 = por %p196_p4, %p195_p3 }
   0xa   : > { %p978_p7 = scmp.ge.s32.totalorder %s1135_s27, 1  ;;  %p249_p8 = scmp.lt.s32.totalorder %s1135_s27, 3 }
   0xc   : > { %p250_p9 = pnand %p978_p7, %p249_p8 }
   0xd   : > { %s282_s19 = sand.u32 (!%p250_p9), 1, %s1127_s25   ;;  %s1303_s20 = sshll.u32 (!%p250_p9), %s1209_s28, 1 }
   0xe   : > { %253 = sbr.rel (%p250_p9) target bundleno = 307 (0x133), region = 48  ;;  %p290_p10 = scmp.lt.s32.totalorder (!%p250_p9), %s1303_s20, 2 }
   0xf   : > { %s979_s9 = sshll.u32 (!%p250_p9), %s282_s19, 3  ;;  %s1542_s14 = scalar_lea.sflag (!%p250_p9), [#allocation3], %s282_s19 }
  0x10   : > { %s284_s13 = scalar_lea.vmem (!%p250_p9), [#allocation2], %s979_s9 }
  0x13   : > { %v306_v0 = vld [vmem:[%s1591_s2] sm:$0xff]  ;;  %v1137_v2 = vmov 0   ;;  %v305_v3 = vld [vmem:[%s1590_s1 + $0x8] sm:$0x3]  ;;  %v1138_v4 = vmov 2   ;;  %v1139_v5 = vmov 1   ;;  %v336_v28 = vlaneseq }
  0x14   : > { %v304_v1 = vld [vmem:[%s1590_s1] sm:$0xff]  ;;  %1041 = vset.pattern.permute.xlu1 %v1137_v2  ;;  %1040 = vset.pattern.permute.xlu0 %v1137_v2  ;;  %v1252_v6 = vld [vmem:[%s1592_s3 + $0x8] sm:$0x3]  ;;  %v1140_v8 = vmov 4   ;;  %v1141_v9 = vmov 3   ;;  %v1142_v10 = vmov 7  }
  0x15   : > { %317 = vperm.xlu0 %1040, %v306_v0   ;;  %327 = vperm.xlu1 %1041, %v304_v1   ;;  %v308_v7 = vld [vmem:[%s1592_s3] sm:$0xff]  ;;  %v311_v11 = vld [vmem:[%s1593_s4 + $0x8] sm:$0x3]  ;;  %v1143_v12 = vmov 5   ;;  %v1144_v17 = vmov 6   ;;  %v1145_v18 = vmov 9  }
  0x16   : > { %v307_v13 = vld [vmem:[%s1591_s2 + $0x8] sm:$0x3]  ;;  %v310_v14 = vld [vmem:[%s1593_s4] sm:$0xff]  ;;  %v1146_v19 = vmov 8   ;;  %s291_s21 = scalar_select %p290_p10, %s1303_s20, 2  ;;  %v337_v29 = vshrl.u32 %v336_v28, 7 }
  0x17   : > { %v313_v15 = vld [vmem:[%s1595_s6] sm:$0x7]  ;;  %s904_s15 = ssub.s32 (%p1226_p5), 3, %s1303_s20 }
  0x18   : > { %v312_v16 = vld [vmem:[%s1594_s5] sm:$0x7]  ;;  %s981_s22 = sshll.u32 %s291_s21, 2  ;;  %v1316_v32 = vsub.s32 0, %v337_v29  ;;  %v1318_v33 = vsub.s32 4, %v337_v29  ;;  %v1322_v37 = vsub.s32 1, %v337_v29 }
  0x19   : > { %1044 = vset.pattern.permute.xlu0 %v1138_v4  ;;  %332 = vperm.xlu1 %1041, %v305_v3   ;;  %s293_s8 = scalar_lea.vmem %s1589_s0, %s981_s22  ;;  %v1324_v38 = vsub.s32 5, %v337_v29  ;;  %v1328_v41 = vsub.s32 2, %v337_v29  ;;  %v1330_v42 = vsub.s32 6, %v337_v29  ;;  %v1334_v46 = vsub.s32 3, %v337_v29  ;;  %p905_p11 = scmp.lt.s32.totalorder (%p1226_p5), %s904_s15, 2 }
  0x1a   : > { %401 = vperm.xlu0 %1044, %v305_v3   ;;  %v314_v35 = vld [vmem:[%s293_s8] sm:$0xff]  ;;  %v1336_v47 = vsub.s32 7, %v337_v29 }
  0x1b   : > { %v339_v39 = vrot.slane %v314_v35, %v1316_v32  ;;  %v343_v40 = vrot.slane %v314_v35, %v1318_v33  ;;  %v373_v44 = vrot.slane %v314_v35, %v1322_v37  ;;  %v377_v45 = vrot.slane %v314_v35, %v1324_v38 }
  0x1c   : > { %v407_v51 = vrot.slane %v314_v35, %v1328_v41  ;;  %v411_v52 = vrot.slane %v314_v35, %v1330_v42  ;;  %v441_v55 = vrot.slane %v314_v35, %v1334_v46  ;;  %v445_v56 = vrot.slane %v314_v35, %v1336_v47 }
  0x1d   : > { %1042 = vset.pattern.permute.xlu1 %v1139_v5  ;;  %v349_v49 = vrot.slane %v339_v39, %v1316_v32  ;;  %v353_v50 = vrot.slane %v343_v40, %v1316_v32  ;;  %v383_v53 = vrot.slane %v373_v44, %v1322_v37  ;;  %v387_v54 = vrot.slane %v377_v45, %v1322_v37 }
  0x1e   : > { %1045 = vset.pattern.permute.xlu0 %v1139_v5  ;;  %367 = vperm.xlu1 %1042, %v305_v3   ;;  %v417_v60 = vrot.slane %v407_v51, %v1328_v41  ;;  %v421_v61 = vrot.slane %v411_v52, %v1328_v41 }
  0x1f   : > { %363 = vperm.xlu0 %1045, %v304_v1  }
  0x22   : > { %1043 = vset.pattern.permute.xlu1 %v1138_v4 }
  0x23   : > { %509 = vperm.xlu0 %1045, %v1252_v6   ;;  %397 = vperm.xlu1 %1043, %v304_v1  }
  0x27   : > { %1051 = vset.pattern.permute.xlu0 %v1140_v8  ;;  %1046 = vset.pattern.permute.xlu1 %v1141_v9 }
  0x28   : > { %577 = vperm.xlu0 %1051, %v308_v7   ;;  %431 = vperm.xlu1 %1046, %v304_v1   ;;  %v1353_v1 = vrot.slane %v441_v55, %v1334_v46 }
  0x2c   : > { %1054 = vset.pattern.permute.xlu0 %v1142_v10  ;;  %435 = vperm.xlu1 %1046, %v305_v3  }
  0x2d   : > { %649 = vperm.xlu0 %1054, %v308_v7  }
  0x30   : > { %1047 = vset.pattern.permute.xlu1 %v1137_v2 }
  0x31   : > { %1059 = vset.pattern.permute.xlu0 %v1143_v12  ;;  %475 = vperm.xlu1 %1047, %v311_v11  }
  0x32   : > { %605 = vperm.xlu0 %1059, %v1252_v6  }
  0x35   : > { %480 = vperm.xlu1 %1047, %v308_v7  }
  0x36   : > { %1060 = vset.pattern.permute.xlu0 %v1137_v2 }
  0x37   : > { %322 = vperm.xlu0 %1060, %v307_v13  }
  0x39   : > { %1048 = vset.pattern.permute.xlu1 %v1139_v5 }
  0x3a   : > { %505 = vperm.xlu1 %1048, %v308_v7  }
  0x3b   : > { %470 = vperm.xlu0 %1060, %v310_v14  }
  0x3e   : > { %1049 = vset.pattern.permute.xlu1 %v1138_v4 }
  0x3f   : > { %485 = vperm.xlu0 %1060, %v1252_v6   ;;  %529 = vperm.xlu1 %1049, %v308_v7  }
  0x43   : > { %726 = vperm.xlu0 %1060, %v313_v15   ;;  %1050 = vset.pattern.permute.xlu1 %v1141_v9 }
  0x44   : > { %553 = vperm.xlu1 %1050, %v308_v7  }
  0x47   : > { %1063 = vset.pattern.permute.xlu0 %v1138_v4 }
  0x48   : > { %533 = vperm.xlu0 %1063, %v1252_v6   ;;  %1052 = vset.pattern.permute.xlu1 %v1143_v12 }
  0x49   : > { %601 = vperm.xlu1 %1052, %v308_v7  }
  0x4c   : > { %763 = vperm.xlu0 %1063, %v312_v16  }
  0x4d   : > { %1053 = vset.pattern.permute.xlu1 %v1144_v17 }
  0x4e   : > { %625 = vperm.xlu1 %1053, %v308_v7  }
  0x50   : > { %1068 = vset.pattern.permute.xlu0 %v1145_v18 }
  0x51   : > { %701 = vperm.xlu0 %1068, %v1252_v6  }
  0x52   : > { %1055 = vset.pattern.permute.xlu1 %v1146_v19 }
  0x53   : > { %673 = vperm.xlu1 %1055, %v308_v7  }
  0x55   : > { %1071 = vset.pattern.permute.xlu0 %v1144_v17 }
  0x56   : > { %827 = vperm.xlu0 %1071, %v312_v16  }
  0x57   : > { %1056 = vset.pattern.permute.xlu1 %v1145_v18 }
  0x58   : > { %697 = vperm.xlu1 %1056, %v308_v7  }
  0x5a   : > { %1074 = vset.pattern.permute.xlu0 %v1145_v18 }
  0x5b   : > { %875 = vperm.xlu0 %1074, %v312_v16  }
  0x5c   : > { %1057 = vset.pattern.permute.xlu1 %v1141_v9 }
  0x5d   : > { %557 = vperm.xlu1 %1057, %v1252_v6  }
  0x61   : > { %1058 = vset.pattern.permute.xlu1 %v1140_v8 }
  0x62   : > { %581 = vperm.xlu1 %1058, %v1252_v6  }
  0x66   : > { %1061 = vset.pattern.permute.xlu1 %v1137_v2  ;;  %v1356_v2 = vrot.slane %v445_v56, %v1334_v46 }
  0x67   : > { %731 = vperm.xlu1 %1061, %v312_v16  }
  0x6b   : > { %1062 = vset.pattern.permute.xlu1 %v1144_v17 }
  0x6c   : > { %629 = vperm.xlu1 %1062, %v1252_v6  }
  0x70   : > { %1064 = vset.pattern.permute.xlu1 %v1139_v5 }
  0x71   : > { %747 = vperm.xlu1 %1064, %v312_v16  }
  0x75   : > { %1065 = vset.pattern.permute.xlu1 %v1142_v10 }
  0x76   : > { %653 = vperm.xlu1 %1065, %v1252_v6  }
  0x7a   : > { %1066 = vset.pattern.permute.xlu1 %v1146_v19 }
  0x7b   : > { %677 = vperm.xlu1 %1066, %v1252_v6  }
  0x7f   : > { %1067 = vset.pattern.permute.xlu1 %v1141_v9 }
  0x80   : > { %779 = vperm.xlu1 %1067, %v312_v16  }
  0x84   : > { %1069 = vset.pattern.permute.xlu1 %v1140_v8 }
  0x85   : > { %795 = vperm.xlu1 %1069, %v312_v16  }
  0x89   : > { %1070 = vset.pattern.permute.xlu1 %v1143_v12 }
  0x8a   : > { %811 = vperm.xlu1 %1070, %v312_v16  }
  0x8e   : > { %1072 = vset.pattern.permute.xlu1 %v1142_v10 }
  0x8f   : > { %843 = vperm.xlu1 %1072, %v312_v16  }
  0x90   : > { %v328_v20 = vpop.permute.xlu1 %327  ;;  %v318_v24 = vpop.permute.xlu0 %317 }
  0x91   : > { %v354_v58 = vmul.f32 %v349_v49, %v328_v20  ;;  %v355_v59 = vmul.f32 %v353_v50, %v328_v20 }
  0x93   : > { %1073 = vset.pattern.permute.xlu1 %v1146_v19  ;;  %v358_v4 = vadd.f32 %v354_v58, %v318_v24  ;;  %v359_v5 = vadd.f32 %v355_v59, %v318_v24 }
  0x94   : > { %859 = vperm.xlu1 %1073, %v312_v16   ;;  %v1297_v21 = vpop.permute.xlu1 %332 }
  0x95   : > { %v1307_v26 = vpop.permute.xlu0 %401 }
  0x99   : > { %v1300_v22 = vpop.permute.xlu1 %367 }
  0x9a   : > { %v364_v31 = vpop.permute.xlu0 %363  ;;  %v390_v58 = vmul.f32 %v383_v53, %v1300_v22  ;;  %v391_v59 = vmul.f32 %v387_v54, %v1300_v22 }
  0x9b   : > { %v388_v63 = vmul.f32 %v383_v53, %v364_v31  ;;  %v389_v0 = vmul.f32 %v387_v54, %v364_v31  ;;  %v357_v31 = vmul.f32 %v353_v50, %v1297_v21 }
  0x9d   : > { %v392_v8 = vadd.f32 %v388_v63, %v358_v4  ;;  %v393_v9 = vadd.f32 %v389_v0, %v359_v5 }
  0x9e   : > { %v398_v23 = vpop.permute.xlu1 %397  ;;  %v1320_v36 = vpop.permute.xlu0 %509 }
  0x9f   : > { %v422_v6 = vmul.f32 %v417_v60, %v398_v23  ;;  %v423_v7 = vmul.f32 %v421_v61, %v398_v23 }
  0xa1   : > { %v426_v13 = vadd.f32 %v422_v6, %v392_v8  ;;  %v427_v14 = vadd.f32 %v423_v7, %v393_v9  ;;  %v425_v7 = vmul.f32 %v421_v61, %v1307_v26 }
  0xa3   : > { %v432_v25 = vpop.permute.xlu1 %431  ;;  %v1338_v48 = vpop.permute.xlu0 %577 }
  0xa4   : > { %v456_v10 = vmul.f32 %v1353_v1, %v432_v25  ;;  %v457_v11 = vmul.f32 %v1356_v2, %v432_v25  ;;  %v356_v25 = vmul.f32 %v349_v49, %v1297_v21 }
  0xa6   : > { %v460_v16 = vadd.f32 %v456_v10, %v426_v13  ;;  %v461_v17 = vadd.f32 %v457_v11, %v427_v14 }
  0xa7   : > { %v1309_v27 = vpop.permute.xlu1 %435 }
  0xa8   : > { %v1350_v62 = vpop.permute.xlu0 %649  ;;  %v464_v20 = vmax.f32 %v460_v16, 0.0  ;;  %v465_v24 = vmax.f32 %v461_v17, 0.0 }
  0xaa   : > { %v1365_v23 = vrot.slane %v464_v20, %v1316_v32  ;;  %v1368_v28 = vrot.slane %v465_v24, %v1316_v32  ;;  %v1377_v44 = vrot.slane %v464_v20, %v1322_v37  ;;  %v1380_v45 = vrot.slane %v465_v24, %v1322_v37 }
  0xab   : > { %v1383_v55 = vrot.slane %v464_v20, %v1328_v41  ;;  %v1386_v49 = vrot.slane %v465_v24, %v1328_v41  ;;  %v1397_v5 = vrot.slane %v464_v20, %v1334_v46  ;;  %v1400_v6 = vrot.slane %v465_v24, %v1334_v46 }
  0xac   : > { %v1311_v30 = vpop.permute.xlu1 %475  ;;  %v1410_v11 = vrot.slane %v465_v24, %v1318_v33 }
  0xad   : > { %v1360_v12 = vpop.permute.xlu0 %605 }
  0xb0   : > { %v481_v34 = vpop.permute.xlu1 %480 }
  0xb1   : > { %v496_v39 = vmul.f32 %v1365_v23, %v481_v34  ;;  %v497_v40 = vmul.f32 %v1368_v28, %v481_v34 }
  0xb2   : > { %v323_v18 = vpop.permute.xlu0 %322 }
  0xb3   : > { %v360_v51 = vadd.f32 %v356_v25, %v323_v18  ;;  %v361_v52 = vadd.f32 %v357_v31, %v323_v18  ;;  %v458_v18 = vmul.f32 %v1353_v1, %v1309_v27  ;;  %v593_v31 = vmul.f32 %v1410_v11, %v1338_v48 }
  0xb4   : > { %v1432_v1 = vrot.slane %v465_v24, %v1330_v42 }
  0xb5   : > { %v506_v43 = vpop.permute.xlu1 %505  ;;  %v394_v8 = vadd.f32 %v390_v58, %v360_v51  ;;  %v395_v53 = vadd.f32 %v391_v59, %v361_v52  ;;  %v1441_v59 = vrot.slane %v464_v20, %v1336_v47 }
  0xb6   : > { %v471_v35 = vpop.permute.xlu0 %470  ;;  %v520_v21 = vmul.f32 %v1377_v44, %v506_v43  ;;  %v521_v50 = vmul.f32 %v1380_v45, %v506_v43  ;;  %v424_v43 = vmul.f32 %v417_v60, %v1307_v26 }
  0xb7   : > { %v500_v56 = vadd.f32 %v496_v39, %v471_v35  ;;  %v501_v34 = vadd.f32 %v497_v40, %v471_v35  ;;  %v429_v26 = vadd.f32 %v425_v7, %v395_v53  ;;  %v1423_v35 = vrot.slane %v464_v20, %v1324_v38 }
  0xb8   : > { %v428_v60 = vadd.f32 %v424_v43, %v394_v8  ;;  %v1426_v39 = vrot.slane %v465_v24, %v1324_v38  ;;  %v1429_v40 = vrot.slane %v464_v20, %v1330_v42 }
  0xb9   : > { %v524_v9 = vadd.f32 %v520_v21, %v500_v56  ;;  %v525_v22 = vadd.f32 %v521_v50, %v501_v34 }
  0xba   : > { %v530_v57 = vpop.permute.xlu1 %529  ;;  %v462_v51 = vadd.f32 %v458_v18, %v428_v60  ;;  %v486_v56 = vpop.permute.xlu0 %485 }
  0xbb   : > { %v544_v0 = vmul.f32 %v1383_v55, %v530_v57  ;;  %v545_v4 = vmul.f32 %v1386_v49, %v530_v57  ;;  %v1407_v57 = vrot.slane %v464_v20, %v1318_v33  ;;  %v499_v18 = vmul.f32 %v1368_v28, %v486_v56 }
  0xbc   : > { %v466_v7 = vmax.f32 %v462_v51, 0.0  ;;  %v523_v28 = vmul.f32 %v1380_v45, %v1320_v36 }
  0xbd   : > { %v548_v13 = vadd.f32 %v544_v0, %v524_v9  ;;  %v549_v14 = vadd.f32 %v545_v4, %v525_v22  ;;  %v592_v25 = vmul.f32 %v1407_v57, %v1338_v48  ;;  %v1444_v0 = vrot.slane %v465_v24, %v1336_v47 }
  0xbe   : > { %v1451_v20 = vrot.slane %v466_v7, %v1316_v32 }
  0xbf   : > { %v554_v3 = vpop.permute.xlu1 %553 }
  0xc0   : > { %v568_v54 = vmul.f32 %v1397_v5, %v554_v3  ;;  %v569_v10 = vmul.f32 %v1400_v6, %v554_v3  ;;  %v459_v3 = vmul.f32 %v1356_v2, %v1309_v27 }
  0xc2   : > { %v572_v61 = vadd.f32 %v568_v54, %v548_v13  ;;  %v573_v17 = vadd.f32 %v569_v10, %v549_v14  ;;  %v463_v27 = vadd.f32 %v459_v3, %v429_v26  ;;  %v665_v54 = vmul.f32 %v1444_v0, %v1350_v62 }
  0xc3   : > { %v1457_v10 = vrot.slane %v466_v7, %v1322_v37 }
  0xc4   : > { %v1362_v15 = vpop.permute.xlu1 %601  ;;  %v596_v52 = vadd.f32 %v592_v25, %v572_v61  ;;  %v597_v21 = vadd.f32 %v593_v31, %v573_v17  ;;  %v467_v8 = vmax.f32 %v463_v27, 0.0  ;;  %v498_v17 = vmul.f32 %v1365_v23, %v486_v56 }
  0xc5   : > { %v616_v48 = vmul.f32 %v1423_v35, %v1362_v15  ;;  %v617_v50 = vmul.f32 %v1426_v39, %v1362_v15  ;;  %v664_v15 = vmul.f32 %v1441_v59, %v1350_v62  ;;  %v522_v23 = vmul.f32 %v1377_v44, %v1320_v36 }
  0xc6   : > { %v1454_v24 = vrot.slane %v467_v8, %v1316_v32  ;;  %v1460_v13 = vrot.slane %v467_v8, %v1322_v37 }
  0xc7   : > { %v620_v4 = vadd.f32 %v616_v48, %v596_v52  ;;  %v621_v43 = vadd.f32 %v617_v50, %v597_v21  ;;  %v502_v21 = vadd.f32 %v498_v17, %v1311_v30  ;;  %v503_v48 = vadd.f32 %v499_v18, %v1311_v30 }
  0xc9   : > { %v626_v19 = vpop.permute.xlu1 %625 }
  0xca   : > { %v640_v34 = vmul.f32 %v1429_v40, %v626_v19  ;;  %v641_v58 = vmul.f32 %v1432_v1, %v626_v19  ;;  %v727_v19 = vpop.permute.xlu0 %726 }
  0xcc   : > { %v644_v9 = vadd.f32 %v640_v34, %v620_v4  ;;  %v645_v22 = vadd.f32 %v641_v58, %v621_v43  ;;  %v526_v34 = vadd.f32 %v522_v23, %v502_v21  ;;  %v527_v58 = vadd.f32 %v523_v28, %v503_v48 }
  0xce   : > { %v1370_v29 = vpop.permute.xlu1 %673  ;;  %v668_v60 = vadd.f32 %v664_v15, %v644_v9  ;;  %v669_v26 = vadd.f32 %v665_v54, %v645_v22  ;;  %v534_v31 = vpop.permute.xlu0 %533 }
  0xcf   : > { %v688_v61 = vmul.f32 %v1451_v20, %v1370_v29  ;;  %v689_v62 = vmul.f32 %v1454_v24, %v1370_v29  ;;  %v546_v56 = vmul.f32 %v1383_v55, %v534_v31 }
  0xd1   : > { %v692_v51 = vadd.f32 %v688_v61, %v668_v60  ;;  %v693_v27 = vadd.f32 %v689_v62, %v669_v26  ;;  %v550_v44 = vadd.f32 %v546_v56, %v526_v34 }
  0xd2   : > { %v764_v17 = vpop.permute.xlu0 %763 }
  0xd3   : > { %v1392_v63 = vpop.permute.xlu1 %697 }
  0xd4   : > { %v712_v3 = vmul.f32 %v1457_v10, %v1392_v63  ;;  %v713_v25 = vmul.f32 %v1460_v13, %v1392_v63  ;;  %v547_v63 = vmul.f32 %v1386_v49, %v534_v31 }
  0xd6   : > { %v716_v50 = vadd.f32 %v712_v3, %v692_v51  ;;  %v717_v29 = vadd.f32 %v713_v25, %v693_v27  ;;  %v551_v9 = vadd.f32 %v547_v63, %v527_v58  ;;  %v702_v28 = vpop.permute.xlu0 %701 }
  0xd8   : > { %v1412_v16 = vpop.permute.xlu1 %557  ;;  %v1484_v7 = vmax.f32 %v716_v50, 0.0  ;;  %v1486_v8 = vmax.f32 %v717_v29, 0.0 }
  0xd9   : > { %v570_v4 = vmul.f32 %v1397_v5, %v1412_v16  ;;  %v571_v30 = vmul.f32 %v1400_v6, %v1412_v16 }
  0xda   : > { %v737_v22 = vrot.slane %v1484_v7, %v1316_v32  ;;  %v741_v5 = vrot.slane %v1486_v8, %v1316_v32  ;;  %v753_v26 = vrot.slane %v1484_v7, %v1322_v37  ;;  %v801_v23 = vrot.slane %v1484_v7, %v1318_v33 }
  0xdb   : > { %v574_v55 = vadd.f32 %v570_v4, %v550_v44  ;;  %v575_v49 = vadd.f32 %v571_v30, %v551_v9  ;;  %v714_v9 = vmul.f32 %v1457_v10, %v702_v28  ;;  %v828_v10 = vpop.permute.xlu0 %827 }
  0xdd   : > { %v582_v2 = vpop.permute.xlu1 %581 }
  0xde   : > { %v594_v36 = vmul.f32 %v1407_v57, %v582_v2  ;;  %v595_v45 = vmul.f32 %v1410_v11, %v582_v2  ;;  %v757_v57 = vrot.slane %v1486_v8, %v1322_v37  ;;  %v618_v11 = vmul.f32 %v1423_v35, %v1360_v12 }
  0xdf   : > { %v619_v2 = vmul.f32 %v1426_v39, %v1360_v12  ;;  %v769_v35 = vrot.slane %v1484_v7, %v1328_v41  ;;  %v773_v12 = vrot.slane %v1486_v8, %v1328_v41  ;;  %v805_v41 = vrot.slane %v1486_v8, %v1318_v33 }
  0xe0   : > { %v598_v16 = vadd.f32 %v594_v36, %v574_v55  ;;  %v599_v15 = vadd.f32 %v595_v45, %v575_v49  ;;  %v715_v36 = vmul.f32 %v1460_v13, %v702_v28  ;;  %v817_v33 = vrot.slane %v1484_v7, %v1324_v38 }
  0xe1   : > { %v775_v56 = vmul.f32 %v773_v12, %v764_v17  ;;  %v821_v49 = vrot.slane %v1486_v8, %v1324_v38 }
  0xe2   : > { %v732_v53 = vpop.permute.xlu1 %731  ;;  %v623_v25 = vadd.f32 %v619_v2, %v599_v15 }
  0xe3   : > { %v742_v54 = vmul.f32 %v737_v22, %v732_v53  ;;  %v743_v60 = vmul.f32 %v741_v5, %v732_v53  ;;  %v622_v53 = vadd.f32 %v618_v11, %v598_v16  ;;  %v833_v22 = vrot.slane %v1484_v7, %v1330_v42 }
  0xe4   : > { %v837_v5 = vrot.slane %v1486_v8, %v1330_v42  ;;  %v853_v42 = vrot.slane %v1486_v8, %v1336_v47 }
  0xe5   : > { %v744_v21 = vadd.f32 %v742_v54, %v727_v19  ;;  %v745_v48 = vadd.f32 %v743_v60, %v727_v19  ;;  %v838_v2 = vmul.f32 %v833_v22, %v828_v10 }
  0xe7   : > { %v630_v14 = vpop.permute.xlu1 %629 }
  0xe8   : > { %v642_v61 = vmul.f32 %v1429_v40, %v630_v14  ;;  %v643_v62 = vmul.f32 %v1432_v1, %v630_v14 }
  0xea   : > { %v646_v39 = vadd.f32 %v642_v61, %v622_v53  ;;  %v647_v40 = vadd.f32 %v643_v62, %v623_v25  ;;  %v839_v61 = vmul.f32 %v837_v5, %v828_v10 }
  0xec   : > { %v748_v52 = vpop.permute.xlu1 %747 }
  0xed   : > { %v758_v18 = vmul.f32 %v753_v26, %v748_v52  ;;  %v759_v3 = vmul.f32 %v757_v57, %v748_v52 }
  0xef   : > { %v760_v52 = vadd.f32 %v758_v18, %v744_v21  ;;  %v761_v50 = vadd.f32 %v759_v3, %v745_v48  ;;  %v849_v18 = vrot.slane %v1484_v7, %v1336_v47 }
  0xf1   : > { %v654_v43 = vpop.permute.xlu1 %653 }
  0xf2   : > { %v666_v31 = vmul.f32 %v1441_v59, %v654_v43  ;;  %v667_v51 = vmul.f32 %v1444_v0, %v654_v43  ;;  %v785_v59 = vrot.slane %v1484_v7, %v1334_v46  ;;  %v789_v0 = vrot.slane %v1486_v8, %v1334_v46 }
  0xf3   : > { %v777_v43 = vadd.f32 %v775_v56, %v761_v50 }
  0xf4   : > { %v670_v19 = vadd.f32 %v666_v31, %v646_v39  ;;  %v671_v29 = vadd.f32 %v667_v51, %v647_v40 }
  0xf6   : > { %v678_v6 = vpop.permute.xlu1 %677 }
  0xf7   : > { %v690_v1 = vmul.f32 %v1451_v20, %v678_v6  ;;  %v691_v14 = vmul.f32 %v1454_v24, %v678_v6  ;;  %v774_v20 = vmul.f32 %v769_v35, %v764_v17  ;;  %v876_v35 = vpop.permute.xlu0 %875 }
  0xf9   : > { %v694_v58 = vadd.f32 %v690_v1, %v670_v19  ;;  %v695_v4 = vadd.f32 %v691_v14, %v671_v29  ;;  %v776_v30 = vadd.f32 %v774_v20, %v760_v52 }
  0xfb   : > { %v780_v27 = vpop.permute.xlu1 %779  ;;  %v718_v6 = vadd.f32 %v714_v9, %v694_v58  ;;  %v719_v16 = vadd.f32 %v715_v36, %v695_v4 }
  0xfc   : > { %v790_v24 = vmul.f32 %v785_v59, %v780_v27  ;;  %v791_v63 = vmul.f32 %v789_v0, %v780_v27 }
  0xfd   : > { %v722_v62 = vmax.f32 %v718_v6, 0.0  ;;  %v723_v38 = vmax.f32 %v719_v16, 0.0 }
  0xfe   : > { %v792_v45 = vadd.f32 %v790_v24, %v776_v30  ;;  %v793_v55 = vadd.f32 %v791_v63, %v777_v43 }
  0xff   : > { %v881_v51 = vrot.slane %v722_v62, %v1322_v37  ;;  %v885_v27 = vrot.slane %v723_v38, %v1322_v37  ;;  %v865_v21 = vrot.slane %v722_v62, %v1316_v32  ;;  %v869_v48 = vrot.slane %v723_v38, %v1316_v32 }
 0x100   : > { %v796_v34 = vpop.permute.xlu1 %795 }
 0x101   : > { %v806_v44 = vmul.f32 %v801_v23, %v796_v34  ;;  %v807_v46 = vmul.f32 %v805_v41, %v796_v34  ;;  %v886_v8 = vmul.f32 %v881_v51, %v876_v35  ;;  %v887_v1 = vmul.f32 %v885_v27, %v876_v35 }
 0x103   : > { %v808_v54 = vadd.f32 %v806_v44, %v792_v45  ;;  %v809_v13 = vadd.f32 %v807_v46, %v793_v55 }
 0x105   : > { %v812_v15 = vpop.permute.xlu1 %811 }
 0x106   : > { %v822_v60 = vmul.f32 %v817_v33, %v812_v15  ;;  %v823_v26 = vmul.f32 %v821_v49, %v812_v15 }
 0x108   : > { %v824_v57 = vadd.f32 %v822_v60, %v808_v54  ;;  %v825_v11 = vadd.f32 %v823_v26, %v809_v13 }
 0x10a   : > { %v844_v17 = vpop.permute.xlu1 %843  ;;  %v840_v3 = vadd.f32 %v838_v2, %v824_v57  ;;  %v841_v53 = vadd.f32 %v839_v61, %v825_v11 }
 0x10b   : > { %v854_v25 = vmul.f32 %v849_v18, %v844_v17  ;;  %v855_v31 = vmul.f32 %v853_v42, %v844_v17 }
 0x10d   : > { %v856_v7 = vadd.f32 %v854_v25, %v840_v3  ;;  %v857_v39 = vadd.f32 %v855_v31, %v841_v53 }
 0x10f   : > { %v860_v12 = vpop.permute.xlu1 %859 }
 0x110   : > { %v870_v40 = vmul.f32 %v865_v21, %v860_v12  ;;  %v871_v47 = vmul.f32 %v869_v48, %v860_v12 }
 0x112   : > { %v872_v14 = vadd.f32 %v870_v40, %v856_v7  ;;  %v873_v52 = vadd.f32 %v871_v47, %v857_v39 }
 0x114   : > { %v888_v50 = vadd.f32 %v886_v8, %v872_v14  ;;  %v889_v59 = vadd.f32 %v887_v1, %v873_v52  ;;  %902 = sbr.rel (!%p1226_p5) target bundleno = 307 (0x133), region = 52 }
 0x116   : > { %v892_v37 = vcombine.low %v888_v50, %v889_v59 }
 0x118   : > { %894 = vst [vmem:[%s284_s13] sm:$0x77] %v892_v37 }
 0x119   : > { %s1604_s15 = smov (!%p905_p11, %s904_s15), 2 }
 0x11a   : > { %s1547_s16 = sshll.u32 %s1604_s15, 6 }
 0x11b   : > { %s909_s17 = ssub.s32 128, %s1547_s16 }
 0x11c   : > { %910 = vsyncadd %s1542_s14, %s909_s17  ;;  %p985_p12 = scmp.ne.s32.totalorder %s1547_s16, 0  ;;  %s991_s18 = sshll.u32 %s1209_s28, 7 }
 0x11d   : > { %s913_s11 = scalar_lea.hbm %s1596_s7, %s991_s18  ;;  %s916_s22 = sshll.u32 %s284_s13, 4  ;;  %s917_s22 = int_to_ptr.vmem [resolvable:$true] %s916_s22 }
 0x11e   : > { %s1075_s20 = scalar_lea.vmem %s917_s22, %s1547_s16  ;;  %s1147_s23 = smov [#allocation2]  }
 0x11f   : > { %p1076_p13 = scmp.ne.s32.totalorder %s917_s22, %s1075_s20  ;;  %s1079_s29 = sshll.u32 %s1147_s23, 4  ;;  %s1080_s29 = int_to_ptr.vmem [resolvable:$false] %s1079_s29 }
 0x120   : > { %s1081_s8 = scalar_lea.vmem %s1080_s29, 256  ;;  %p1082_p2 = scmp.lt.s32.totalorder %s917_s22, %s1080_s29 }
 0x121   : > { %p1077_p0 = pnand %p1076_p13, %p985_p12  ;;  %p1083_p3 = scmp.lt.s32.totalorder %s1081_s8, %s1075_s20 }
 0x123   : > { %p1078_p1 = pneg %p1077_p0  ;;  %p1084_p4 = por %p1083_p3, %p1082_p2 }
 0x125   : > { %p1085_p5 = pnand %p1084_p4, %p1078_p1 }
 0x127   : > { %1088 = shalt.err (!%p1085_p5)
}
 0x128   : > { %s1089_s28 = scalar_lea.hbm %s913_s11, %s1547_s16  ;;  %s1093_s15 = scalar_lea.hbm %s1596_s7, 192 }
 0x129   : > { %p1090_p7 = scmp.ne.s32.totalorder %s913_s11, %s1089_s28  ;;  %p1094_p10 = scmp.lt.s32.totalorder %s913_s11, %s1596_s7 }
 0x12a   : > { %p1095_p11 = scmp.lt.s32.totalorder %s1093_s15, %s1089_s28 }
 0x12b   : > { %p1091_p8 = pnand %p1090_p7, %p985_p12 }
 0x12c   : > { %p1096_p13 = por %p1095_p11, %p1094_p10 }
 0x12d   : > { %p1092_p9 = pneg %p1091_p8 }
 0x12f   : > { %p1097_p0 = pnand %p1096_p13, %p1092_p9 }
 0x131   : > { %1100 = shalt.err (!%p1097_p0)
}
 0x132   : > { %919 = dma.vmem_to_hbm [thread:$0]  (%p985_p12), %s917_s22, %s1547_s16, %s913_s11, %s1542_s14  }
 0x133 PF: > { %p997_p1 = scmp.ge.s32.totalorder %s1135_s27, 2  ;;  %s928_s19 = sand.u32 1, %s1123_s24  }
 0x134   : > { %s929_s21 = scalar_lea.sflag [#allocation3], %s928_s19 }
 0x135   : > { %p994_p2 = pnand %p997_p1, %p1230_p6 }
 0x137   : > { %p995_p3 = pneg %p994_p2 }
 0x139   : > { %1118 = dma.done.wait (%p995_p3), %s929_s21, 128  }
 0x13a   : > { %1120 = vsyncadd (%p995_p3), %s929_s21, 4294967168  ;;  %p17_p4 = scmp.ge.s32.totalorder %s1213_s30, 4   ;;  %s1599_s24 = smov %s1127_s25 }
 0x13b   : > { %s1600_s25 = smov %s1131_s26  ;;  %s1601_s26 = smov %s1224_s10 }
 0x13c   : > { %s1602_s27 = smov %s1213_s30  ;;  %19 = sbr.rel (!%p17_p4) target bundleno = 3 (0x3), region = 83 }
 0x141   :  { %934 = vsyncpa [#allocation3], 1 }
 0x142   :  { %936 = vsyncpa [#allocation3 + $0x1], 1 }

</bundles_post_ra>
